<compile_context>
chip_gen: v5e
topology: v5e:2x2
jax: 0.10.0
libtpu: 0.0.40
codegen_flags: <defaults>
</compile_context>

<pallas_src>
import functools
import math
from dataclasses import dataclass

import jax
import jax.numpy as jnp
from jax.experimental import pallas as pl
from jax.experimental.pallas import tpu as pltpu

PARAM_DTYPE = jnp.bfloat16   # matmul operand dtype (f32 accumulation everywhere)
NEG_BIG = -1e30              # finite mask value (review: avoid -inf arithmetic)


@dataclass
class LocalRotaryModelArgs:
    dim: int = 32
    n_layers: int = 2
    n_heads: int = 4
    vocab_size: int = 64
    multiple_of: int = 1
    ffn_dim_multiplier: float = None
    norm_eps: float = 1e-5
    rope_theta: float = 500000.0
    max_seq_len: int = 4


def _pick_tile(total, target):
    return target if total % target == 0 else total


# --------------------------------------------------------------------------
# In-kernel helpers
# --------------------------------------------------------------------------
def _rmsnorm(x, w, eps):
    # x: (T, D) f32, w: (1, D) f32
    return (x * jax.lax.rsqrt(jnp.mean(x * x, axis=-1, keepdims=True) + eps)) * w


# --------------------------------------------------------------------------
# Kernel 1: RMSNorm + fused QKV projection + RoPE  -> head-major q/k/v (bf16)
# --------------------------------------------------------------------------
def _qkv_rope_kernel(x_ref, anw_ref, wqkv_ref, cos_ref, sin_ref,
                     q_ref, k_ref, v_ref, *, n_heads, head_dim, eps):
    H, hd = n_heads, head_dim
    hd2 = hd // 2
    D = x_ref.shape[-1]
    D2 = D // 2

    x = x_ref[0]                                   # (TS, D) f32
    xn = _rmsnorm(x, anw_ref[...], eps)
    qkv = jnp.dot(xn.astype(wqkv_ref.dtype), wqkv_ref[...],
                  preferred_element_type=jnp.float32)      # (TS, 3D)

    q, k, v = qkv[:, :D], qkv[:, D:2 * D], qkv[:, 2 * D:]
    cosf, sinf = cos_ref[...], sin_ref[...]        # (TS, D2), per-head tiled

    # RoPE on the lane-packed "halves" layout: columns 0:D2 hold the real
    # parts of every head, D2:D the imaginary parts (permutation done in wqkv).
    qa, qb = q[:, :D2], q[:, D2:]
    ka, kb = k[:, :D2], k[:, D2:]
    q_a = qa * cosf - qb * sinf
    q_b = qa * sinf + qb * cosf
    k_a = ka * cosf - kb * sinf
    k_b = ka * sinf + kb * cosf

    dt = q_ref.dtype
    for h in range(H):                             # static scatter to head-major
        lo, hi = h * hd2, (h + 1) * hd2
        q_ref[0, h, :, :hd2] = q_a[:, lo:hi].astype(dt)
        q_ref[0, h, :, hd2:] = q_b[:, lo:hi].astype(dt)
        k_ref[0, h, :, :hd2] = k_a[:, lo:hi].astype(dt)
        k_ref[0, h, :, hd2:] = k_b[:, lo:hi].astype(dt)
        v_ref[0, h] = v[:, h * hd:(h + 1) * hd].astype(dt)


def qkv_rope(x, lp, cosf, sinf, *, n_heads, head_dim, eps, seq_tile=128):
    B, S, D = x.shape
    H, hd = n_heads, head_dim
    D2 = D // 2
    ts = _pick_tile(S, min(seq_tile, S))
    ns = S // ts

    kernel = functools.partial(_qkv_rope_kernel, n_heads=H, head_dim=hd, eps=eps)
    out_sd = jax.ShapeDtypeStruct((B, H, S, hd), lp["wqkv"].dtype)
    qkv_spec = pl.BlockSpec((1, H, ts, hd), lambda b, s: (b, 0, s, 0))

    return pl.pallas_call(
        kernel,
        out_shape=(out_sd, out_sd, out_sd),
        grid=(B, ns),
        in_specs=[
            pl.BlockSpec((1, ts, D), lambda b, s: (b, s, 0)),   # x
            pl.BlockSpec((1, D), lambda b, s: (0, 0)),          # attn_norm weight
            pl.BlockSpec((D, 3 * D), lambda b, s: (0, 0)),      # fused wqkv (bf16)
            pl.BlockSpec((ts, D2), lambda b, s: (s, 0)),        # cos (packed)
            pl.BlockSpec((ts, D2), lambda b, s: (s, 0)),        # sin (packed)
        ],
        out_specs=(qkv_spec, qkv_spec, qkv_spec),
        compiler_params=pltpu.CompilerParams(
            dimension_semantics=("parallel", "parallel")),
    )(x, lp["attn_norm_w"], lp["wqkv"], cosf, sinf)


# --------------------------------------------------------------------------
# Kernel 2: flash-style local attention + output proj + residual + SwiGLU FFN
# --------------------------------------------------------------------------
def _attn_ffn_kernel(x_ref, q_ref, k_ref, v_ref, wo_ref, fnw_ref,
                     w1_ref, w2_ref, w3_ref, out_ref,
                     m_sc, l_sc, acc_sc, *, window, eps, q_tile, kv_tile):
    iq = pl.program_id(1)
    ikv = pl.program_id(2)
    nkv = pl.num_programs(2)
    TQ, TKV = q_tile, kv_tile

    @pl.when(ikv == 0)
    def _():
        m_sc[...] = jnp.full_like(m_sc, NEG_BIG)
        l_sc[...] = jnp.zeros_like(l_sc)
        acc_sc[...] = jnp.zeros_like(acc_sc)

    q_start = iq * TQ
    kv_start = ikv * TKV
    # KV tile contributes iff some (q, k) pair is causal and within the window.
    do_work = jnp.logical_and(kv_start <= q_start + (TQ - 1),
                              kv_start + (TKV - 1) >= q_start - window)

    @pl.when(do_work)
    def _():
        q = q_ref[0]                                    # (H, TQ, hd)  bf16
        k = k_ref[0]                                    # (H, TKV, hd) bf16
        v = v_ref[0]                                    # (H, TKV, hd) bf16
        s = jnp.einsum('hqe,hke->hqk', q, k,
                       preferred_element_type=jnp.float32)   # (H, TQ, TKV)

        qpos = q_start + jax.lax.broadcasted_iota(jnp.int32, (TQ, TKV), 0)
        kpos = kv_start + jax.lax.broadcasted_iota(jnp.int32, (TQ, TKV), 1)
        masked = jnp.logical_or(kpos > qpos,
                                jnp.abs(kpos - qpos) > window)[None, :, :]
        s = jnp.where(masked, NEG_BIG, s)

        m_prev = m_sc[...]
        m_new = jnp.maximum(m_prev, jnp.max(s, axis=-1, keepdims=True))
        alpha = jnp.exp(m_prev - m_new)
        p = jnp.where(masked, 0.0, jnp.exp(s - m_new))
        l_sc[...] = alpha * l_sc[...] + jnp.sum(p, axis=-1, keepdims=True)
        acc_sc[...] = alpha * acc_sc[...] + jnp.einsum(
            'hqk,hke->hqe', p.astype(v.dtype), v,
            preferred_element_type=jnp.float32)
        m_sc[...] = m_new

    @pl.when(ikv == nkv - 1)
    def _():
        o = acc_sc[...] * pl.reciprocal(l_sc[...], approx=True)   # (H, TQ, hd)
        ctx = jnp.einsum('hqe,hed->hqd', o.astype(wo_ref.dtype), wo_ref[...],
                         preferred_element_type=jnp.float32)      # (H, TQ, D)
        attn = jnp.sum(ctx, axis=0)                               # (TQ, D)
        h1 = x_ref[0] + attn
        hn = _rmsnorm(h1, fnw_ref[...], eps)
        hnb = hn.astype(w1_ref.dtype)
        a = jnp.dot(hnb, w1_ref[...], preferred_element_type=jnp.float32)
        g = jnp.dot(hnb, w3_ref[...], preferred_element_type=jnp.float32)
        ff = jnp.dot((a * jax.nn.sigmoid(a) * g).astype(w2_ref.dtype),
                     w2_ref[...], preferred_element_type=jnp.float32)
        out_ref[0] = h1 + ff


def attn_ffn(x, q, k, v, lp, *, window, eps, n_heads, head_dim,
             q_tile=128, kv_tile=128):
    B, S, D = x.shape
    H, hd = n_heads, head_dim
    Dff = lp["w1"].shape[1]
    tq = _pick_tile(S, min(q_tile, S))
    tkv = _pick_tile(S, min(kv_tile, S))
    nq, nkv = S // tq, S // tkv

    kernel = functools.partial(_attn_ffn_kernel, window=window, eps=eps,
                               q_tile=tq, kv_tile=tkv)
    return pl.pallas_call(
        kernel,
        out_shape=jax.ShapeDtypeStruct((B, S, D), jnp.float32),
        grid=(B, nq, nkv),
        in_specs=[
            pl.BlockSpec((1, tq, D), lambda b, i, j: (b, i, 0)),          # x (residual)
            pl.BlockSpec((1, H, tq, hd), lambda b, i, j: (b, 0, i, 0)),   # q
            pl.BlockSpec((1, H, tkv, hd), lambda b, i, j: (b, 0, j, 0)),  # k
            pl.BlockSpec((1, H, tkv, hd), lambda b, i, j: (b, 0, j, 0)),  # v
            pl.BlockSpec((H, hd, D), lambda b, i, j: (0, 0, 0)),          # wo (per head)
            pl.BlockSpec((1, D), lambda b, i, j: (0, 0)),                 # ffn_norm weight
            pl.BlockSpec((D, Dff), lambda b, i, j: (0, 0)),               # w1
            pl.BlockSpec((Dff, D), lambda b, i, j: (0, 0)),               # w2
            pl.BlockSpec((D, Dff), lambda b, i, j: (0, 0)),               # w3
        ],
        out_specs=pl.BlockSpec((1, tq, D), lambda b, i, j: (b, i, 0)),
        scratch_shapes=[
            pltpu.VMEM((H, tq, 1), jnp.float32),    # running max
            pltpu.VMEM((H, tq, 1), jnp.float32),    # running denom
            pltpu.VMEM((H, tq, hd), jnp.float32),   # accumulator
        ],
        compiler_params=pltpu.CompilerParams(
            dimension_semantics=("parallel", "parallel", "arbitrary")),
    )(x, q, k, v, lp["wo_h"], lp["ffn_norm_w"], lp["w1"], lp["w2"], lp["w3"])


# --------------------------------------------------------------------------
# Kernel 3: final RMSNorm + streaming vocab projection + running argmax
# --------------------------------------------------------------------------
def _lm_head_kernel(h_ref, nw_ref, wout_ref, tok_ref,
                    hn_sc, max_sc, arg_sc, *, eps, v_tile):
    j = pl.program_id(1)
    nv = pl.num_programs(1)

    @pl.when(j == 0)
    def _():
        hn_sc[...] = _rmsnorm(h_ref[0], nw_ref[...], eps).astype(hn_sc.dtype)
        max_sc[...] = jnp.full_like(max_sc, -jnp.inf)
        arg_sc[...] = jnp.zeros_like(arg_sc)

    logits = jnp.dot(hn_sc[...], wout_ref[...],
                     preferred_element_type=jnp.float32)        # (S, TV)
    tile_max = jnp.max(logits, axis=-1, keepdims=True)          # (S, 1)
    idx = j * v_tile + jax.lax.broadcasted_iota(jnp.int32, logits.shape, 1)
    sentinel = j * v_tile + v_tile
    tile_arg = jnp.min(jnp.where(logits == tile_max, idx, sentinel),
                       axis=-1, keepdims=True)                  # (S, 1) int32
    better = tile_max > max_sc[...]                             # strict: first occurrence
    arg_sc[...] = jnp.where(better, tile_arg, arg_sc[...])
    max_sc[...] = jnp.maximum(max_sc[...], tile_max)

    @pl.when(j == nv - 1)
    def _():
        tok_ref[0] = arg_sc[...]


def lm_head(h, norm_w, wout, *, eps, v_tile=128):
    B, S, D = h.shape
    V = wout.shape[1]
    tv = _pick_tile(V, min(v_tile, V))
    nv = V // tv

    kernel = functools.partial(_lm_head_kernel, eps=eps, v_tile=tv)
    out = pl.pallas_call(
        kernel,
        out_shape=jax.ShapeDtypeStruct((B, S, 1), jnp.int32),
        grid=(B, nv),
        in_specs=[
            pl.BlockSpec((1, S, D), lambda b, j: (b, 0, 0)),    # hidden states
            pl.BlockSpec((1, D), lambda b, j: (0, 0)),          # final norm weight
            pl.BlockSpec((D, tv), lambda b, j: (0, j)),         # vocab tile (bf16)
        ],
        out_specs=pl.BlockSpec((1, S, 1), lambda b, j: (b, 0, 0)),
        scratch_shapes=[
            pltpu.VMEM((S, D), wout.dtype),       # normed hidden (reused across V tiles)
            pltpu.VMEM((S, 1), jnp.float32),      # running max
            pltpu.VMEM((S, 1), jnp.int32),        # running argmax
        ],
        compiler_params=pltpu.CompilerParams(
            dimension_semantics=("parallel", "arbitrary")),
    )(h, norm_w, wout)
    return out[..., 0]


# --------------------------------------------------------------------------
# Glue: rope tables, params, full forward
# --------------------------------------------------------------------------
def rope_tables(head_dim, n_heads, seqlen, theta):
    """cos/sin pre-broadcast to the packed (S, n_heads*head_dim/2) layout."""
    hd2 = head_dim // 2
    inv = 1.0 / (theta ** (jnp.arange(0, head_dim, 2, dtype=jnp.float32)[:hd2]
                           / head_dim))
    t = jnp.arange(seqlen, dtype=jnp.float32)
    ang = jnp.outer(t, inv)                                  # (S, hd2)
    cosf = jnp.tile(jnp.cos(ang), (1, n_heads))              # (S, H*hd2)
    sinf = jnp.tile(jnp.sin(ang), (1, n_heads))
    return cosf, sinf


def init_params(key, cfg: LocalRotaryModelArgs):
    D, H, V = cfg.dim, cfg.n_heads, cfg.vocab_size
    hd = D // H
    hd2 = hd // 2
    hidden = cfg.dim
    if cfg.ffn_dim_multiplier is not None:
        hidden = int(cfg.ffn_dim_multiplier * hidden)
    Dff = cfg.multiple_of * ((hidden + cfg.multiple_of - 1) // cfg.multiple_of)

    scale = 0.02
    keys = iter(jax.random.split(key, 2 + cfg.n_layers * 5))

    # Column permutation for q/k: per head, move (real, imag) interleaved
    # pairs into two contiguous halves across all heads (lane-dense RoPE).
    a_idx = (jnp.arange(H)[:, None] * hd
             + 2 * jnp.arange(hd2)[None, :]).reshape(-1)      # (D/2,)
    perm = jnp.concatenate([a_idx, a_idx + 1])                # (D,)

    params = {
        "tok_emb": jax.random.normal(next(keys), (V, D), jnp.float32),
        "norm_w": jnp.ones((1, D), jnp.float32),
        "wout": (jax.random.normal(next(keys), (D, V), jnp.float32)
                 * scale).astype(PARAM_DTYPE),
        "layers": [],
    }
    for _ in range(cfg.n_layers):
        wq = jax.random.normal(next(keys), (D, D), jnp.float32) * scale
        wk = jax.random.normal(next(keys), (D, D), jnp.float32) * scale
        wv = jax.random.normal(next(keys), (D, D), jnp.float32) * scale
        wo = jax.random.normal(next(keys), (D, D), jnp.float32) * scale
        lk = jax.random.split(next(keys), 3)

        wq_p = wq[:, perm] / math.sqrt(hd)     # fold 1/sqrt(head_dim) into wq
        wk_p = wk[:, perm]
        wqkv = jnp.concatenate([wq_p, wk_p, wv], axis=1).astype(PARAM_DTYPE)

        params["layers"].append({
            "attn_norm_w": jnp.ones((1, D), jnp.float32),
            "ffn_norm_w": jnp.ones((1, D), jnp.float32),
            "wqkv": wqkv,                                      # (D, 3D) bf16
            "wo_h": wo.reshape(H, hd, D).astype(PARAM_DTYPE),  # (H, hd, D) bf16
            "w1": (jax.random.normal(lk[0], (D, Dff), jnp.float32)
                   * scale).astype(PARAM_DTYPE),
            "w2": (jax.random.normal(lk[1], (Dff, D), jnp.float32)
                   * scale).astype(PARAM_DTYPE),
            "w3": (jax.random.normal(lk[2], (D, Dff), jnp.float32)
                   * scale).astype(PARAM_DTYPE),
        })
    return params


def local_rotary_forward(tokens, params, cfg: LocalRotaryModelArgs):
    B, S = tokens.shape
    D, H = cfg.dim, cfg.n_heads
    hd = D // H

    h = params["tok_emb"][tokens].astype(jnp.float32)        # embedding gather (glue)
    cosf, sinf = rope_tables(hd, H, S, cfg.rope_theta)

    for lp in params["layers"]:
        q, k, v = qkv_rope(h, lp, cosf, sinf,
                           n_heads=H, head_dim=hd, eps=cfg.norm_eps)
        h = attn_ffn(h, q, k, v, lp, window=cfg.max_seq_len,
                     eps=cfg.norm_eps, n_heads=H, head_dim=hd)

    return lm_head(h, params["norm_w"], params["wout"], eps=cfg.norm_eps)


if __name__ == "__main__":
    cfg = LocalRotaryModelArgs(dim=32, n_layers=2, n_heads=4, vocab_size=64,
                               multiple_of=1, norm_eps=1e-5,
                               rope_theta=500000.0, max_seq_len=4)
    key = jax.random.PRNGKey(0)
    pkey, tkey = jax.random.split(key)
    params = init_params(pkey, cfg)
    tokens = jax.random.randint(tkey, (2, 8), 0, cfg.vocab_size, dtype=jnp.int32)

    out = local_rotary_forward(tokens, params, cfg)
    out = jax.block_until_ready(out)
    assert out.shape == (2, 8) and out.dtype == jnp.int32
    print("KERNEL_OK")
</pallas_src>

<mosaic_0001>
module attributes {stable_mosaic.version = 11 : i64} {
  func.func @_qkv_rope_kernel(%arg0: i32, %arg1: i32, %arg2: memref<1x8x32xf32, #tpu.memory_space<vmem>>, %arg3: memref<1x32xf32, #tpu.memory_space<vmem>>, %arg4: memref<32x96xbf16, #tpu.memory_space<vmem>>, %arg5: memref<8x16xf32, #tpu.memory_space<vmem>>, %arg6: memref<8x16xf32, #tpu.memory_space<vmem>>, %arg7: memref<1x4x8x8xbf16, #tpu.memory_space<vmem>>, %arg8: memref<1x4x8x8xbf16, #tpu.memory_space<vmem>>, %arg9: memref<1x4x8x8xbf16, #tpu.memory_space<vmem>>) attributes {dimension_semantics = [#tpu.dimension_semantics<parallel>, #tpu.dimension_semantics<parallel>], iteration_bounds = array<i64: 2, 1>, scalar_prefetch = 0 : i64, scratch_operands = 0 : i64, tpu.core_type = #tpu.core_type<tc>, window_params = [{transform_indices = @transform_0, window_bounds = array<i64: 1, 8, 32>}, {pipeline_mode = #tpu.pipeline_mode<synchronous>, transform_indices = @transform_1, window_bounds = array<i64: 1, 32>}, {pipeline_mode = #tpu.pipeline_mode<synchronous>, transform_indices = @transform_2, window_bounds = array<i64: 32, 96>}, {transform_indices = @transform_3, window_bounds = array<i64: 8, 16>}, {transform_indices = @transform_4, window_bounds = array<i64: 8, 16>}, {transform_indices = @transform_5, window_bounds = array<i64: 1, 4, 8, 8>}, {transform_indices = @transform_6, window_bounds = array<i64: 1, 4, 8, 8>}, {transform_indices = @transform_7, window_bounds = array<i64: 1, 4, 8, 8>}]} {
    %c0 = arith.constant 0 : index
    %c0_0 = arith.constant 0 : index
    %c0_1 = arith.constant 0 : index
    %0 = vector.load %arg2[%c0, %c0_0, %c0_1] : memref<1x8x32xf32, #tpu.memory_space<vmem>>, vector<1x8x32xf32>
    %1 = vector.shape_cast %0 : vector<1x8x32xf32> to vector<8x32xf32>
    %c0_2 = arith.constant 0 : index
    %c0_3 = arith.constant 0 : index
    %2 = vector.load %arg3[%c0_2, %c0_3] : memref<1x32xf32, #tpu.memory_space<vmem>>, vector<1x32xf32>
    %3 = arith.mulf %1, %1 : vector<8x32xf32>
    %cst = arith.constant dense<0.000000e+00> : vector<8xf32>
    %4 = vector.multi_reduction <add>, %3, %cst [1] : vector<8x32xf32> to vector<8xf32>
    %5 = vector.shape_cast %4 : vector<8xf32> to vector<8x1xf32>
    %cst_4 = arith.constant 3.200000e+01 : f32
    %6 = vector.broadcast %cst_4 : f32 to vector<8x1xf32>
    %7 = arith.divf %5, %6 : vector<8x1xf32>
    %cst_5 = arith.constant 9.99999974E-6 : f32
    %8 = vector.broadcast %cst_5 : f32 to vector<8x1xf32>
    %9 = arith.addf %7, %8 : vector<8x1xf32>
    %10 = math.rsqrt %9 : vector<8x1xf32>
    %11 = vector.broadcast %10 : vector<8x1xf32> to vector<8x32xf32>
    %12 = arith.mulf %1, %11 : vector<8x32xf32>
    %13 = vector.broadcast %2 : vector<1x32xf32> to vector<8x32xf32>
    %14 = arith.mulf %12, %13 : vector<8x32xf32>
    %15 = arith.truncf %14 : vector<8x32xf32> to vector<8x32xbf16>
    %c0_6 = arith.constant 0 : index
    %c0_7 = arith.constant 0 : index
    %16 = vector.load %arg4[%c0_6, %c0_7] : memref<32x96xbf16, #tpu.memory_space<vmem>>, vector<32x96xbf16>
    %cst_8 = arith.constant dense<0.000000e+00> : vector<8x96xf32>
    %17 = tpu.matmul %15, %16, %cst_8 {dimension_numbers = #tpu.dot_dimension_numbers<[1], [0], [0], [1], [0, 0, 1, 1], [], []>} : vector<8x32xbf16>, vector<32x96xbf16>, vector<8x96xf32> -> vector<8x96xf32>
    %18 = vector.extract_strided_slice %17 {offsets = [0, 0], sizes = [8, 32], strides = [1, 1]} : vector<8x96xf32> to vector<8x32xf32>
    %19 = vector.extract_strided_slice %17 {offsets = [0, 32], sizes = [8, 32], strides = [1, 1]} : vector<8x96xf32> to vector<8x32xf32>
    %20 = vector.extract_strided_slice %17 {offsets = [0, 64], sizes = [8, 32], strides = [1, 1]} : vector<8x96xf32> to vector<8x32xf32>
    %c0_9 = arith.constant 0 : index
    %c0_10 = arith.constant 0 : index
    %21 = vector.load %arg5[%c0_9, %c0_10] : memref<8x16xf32, #tpu.memory_space<vmem>>, vector<8x16xf32>
    %c0_11 = arith.constant 0 : index
    %c0_12 = arith.constant 0 : index
    %22 = vector.load %arg6[%c0_11, %c0_12] : memref<8x16xf32, #tpu.memory_space<vmem>>, vector<8x16xf32>
    %23 = vector.extract_strided_slice %18 {offsets = [0, 0], sizes = [8, 16], strides = [1, 1]} : vector<8x32xf32> to vector<8x16xf32>
    %24 = vector.extract_strided_slice %18 {offsets = [0, 16], sizes = [8, 16], strides = [1, 1]} : vector<8x32xf32> to vector<8x16xf32>
    %25 = vector.extract_strided_slice %19 {offsets = [0, 0], sizes = [8, 16], strides = [1, 1]} : vector<8x32xf32> to vector<8x16xf32>
    %26 = vector.extract_strided_slice %19 {offsets = [0, 16], sizes = [8, 16], strides = [1, 1]} : vector<8x32xf32> to vector<8x16xf32>
    %27 = arith.mulf %23, %21 : vector<8x16xf32>
    %28 = arith.mulf %24, %22 : vector<8x16xf32>
    %29 = arith.subf %27, %28 : vector<8x16xf32>
    %30 = arith.mulf %23, %22 : vector<8x16xf32>
    %31 = arith.mulf %24, %21 : vector<8x16xf32>
    %32 = arith.addf %30, %31 : vector<8x16xf32>
    %33 = arith.mulf %25, %21 : vector<8x16xf32>
    %34 = arith.mulf %26, %22 : vector<8x16xf32>
    %35 = arith.subf %33, %34 : vector<8x16xf32>
    %36 = arith.mulf %25, %22 : vector<8x16xf32>
    %37 = arith.mulf %26, %21 : vector<8x16xf32>
    %38 = arith.addf %36, %37 : vector<8x16xf32>
    %39 = vector.extract_strided_slice %29 {offsets = [0, 0], sizes = [8, 4], strides = [1, 1]} : vector<8x16xf32> to vector<8x4xf32>
    %40 = arith.truncf %39 : vector<8x4xf32> to vector<8x4xbf16>
    %c0_13 = arith.constant 0 : index
    %c0_14 = arith.constant 0 : index
    %c0_15 = arith.constant 0 : index
    %c0_16 = arith.constant 0 : index
    %41 = vector.load %arg7[%c0_13, %c0_14, %c0_15, %c0_16] : memref<1x4x8x8xbf16, #tpu.memory_space<vmem>>, vector<1x1x8x4xbf16>
    %42 = vector.shape_cast %41 : vector<1x1x8x4xbf16> to vector<8x4xbf16>
    %43 = vector.shape_cast %40 : vector<8x4xbf16> to vector<1x1x8x4xbf16>
    tpu.vector_store %arg7[%c0_13, %c0_14, %c0_15, %c0_16], %43 {strides = array<i32>} : memref<1x4x8x8xbf16, #tpu.memory_space<vmem>>, vector<1x1x8x4xbf16>,
    %44 = vector.extract_strided_slice %32 {offsets = [0, 0], sizes = [8, 4], strides = [1, 1]} : vector<8x16xf32> to vector<8x4xf32>
    %45 = arith.truncf %44 : vector<8x4xf32> to vector<8x4xbf16>
    %c0_17 = arith.constant 0 : index
    %c0_18 = arith.constant 0 : index
    %c0_19 = arith.constant 0 : index
    %c4 = arith.constant 4 : index
    %46 = vector.load %arg7[%c0_17, %c0_18, %c0_19, %c4] : memref<1x4x8x8xbf16, #tpu.memory_space<vmem>>, vector<1x1x8x4xbf16>
    %47 = vector.shape_cast %46 : vector<1x1x8x4xbf16> to vector<8x4xbf16>
    %48 = vector.shape_cast %45 : vector<8x4xbf16> to vector<1x1x8x4xbf16>
    tpu.vector_store %arg7[%c0_17, %c0_18, %c0_19, %c4], %48 {strides = array<i32>} : memref<1x4x8x8xbf16, #tpu.memory_space<vmem>>, vector<1x1x8x4xbf16>,
    %49 = vector.extract_strided_slice %35 {offsets = [0, 0], sizes = [8, 4], strides = [1, 1]} : vector<8x16xf32> to vector<8x4xf32>
    %50 = arith.truncf %49 : vector<8x4xf32> to vector<8x4xbf16>
    %c0_20 = arith.constant 0 : index
    %c0_21 = arith.constant 0 : index
    %c0_22 = arith.constant 0 : index
    %c0_23 = arith.constant 0 : index
    %51 = vector.load %arg8[%c0_20, %c0_21, %c0_22, %c0_23] : memref<1x4x8x8xbf16, #tpu.memory_space<vmem>>, vector<1x1x8x4xbf16>
    %52 = vector.shape_cast %51 : vector<1x1x8x4xbf16> to vector<8x4xbf16>
    %53 = vector.shape_cast %50 : vector<8x4xbf16> to vector<1x1x8x4xbf16>
    tpu.vector_store %arg8[%c0_20, %c0_21, %c0_22, %c0_23], %53 {strides = array<i32>} : memref<1x4x8x8xbf16, #tpu.memory_space<vmem>>, vector<1x1x8x4xbf16>,
    %54 = vector.extract_strided_slice %38 {offsets = [0, 0], sizes = [8, 4], strides = [1, 1]} : vector<8x16xf32> to vector<8x4xf32>
    %55 = arith.truncf %54 : vector<8x4xf32> to vector<8x4xbf16>
    %c0_24 = arith.constant 0 : index
    %c0_25 = arith.constant 0 : index
    %c0_26 = arith.constant 0 : index
    %c4_27 = arith.constant 4 : index
    %56 = vector.load %arg8[%c0_24, %c0_25, %c0_26, %c4_27] : memref<1x4x8x8xbf16, #tpu.memory_space<vmem>>, vector<1x1x8x4xbf16>
    %57 = vector.shape_cast %56 : vector<1x1x8x4xbf16> to vector<8x4xbf16>
    %58 = vector.shape_cast %55 : vector<8x4xbf16> to vector<1x1x8x4xbf16>
    tpu.vector_store %arg8[%c0_24, %c0_25, %c0_26, %c4_27], %58 {strides = array<i32>} : memref<1x4x8x8xbf16, #tpu.memory_space<vmem>>, vector<1x1x8x4xbf16>,
    %59 = vector.extract_strided_slice %20 {offsets = [0, 0], sizes = [8, 8], strides = [1, 1]} : vector<8x32xf32> to vector<8x8xf32>
    %60 = arith.truncf %59 : vector<8x8xf32> to vector<8x8xbf16>
    %c0_28 = arith.constant 0 : index
    %c0_29 = arith.constant 0 : index
    %c0_30 = arith.constant 0 : index
    %c0_31 = arith.constant 0 : index
    %61 = vector.load %arg9[%c0_28, %c0_29, %c0_30, %c0_31] : memref<1x4x8x8xbf16, #tpu.memory_space<vmem>>, vector<1x1x8x8xbf16>
    %62 = vector.shape_cast %61 : vector<1x1x8x8xbf16> to vector<8x8xbf16>
    %63 = vector.shape_cast %60 : vector<8x8xbf16> to vector<1x1x8x8xbf16>
    tpu.vector_store %arg9[%c0_28, %c0_29, %c0_30, %c0_31], %63 {strides = array<i32>} : memref<1x4x8x8xbf16, #tpu.memory_space<vmem>>, vector<1x1x8x8xbf16>,
    %64 = vector.extract_strided_slice %29 {offsets = [0, 4], sizes = [8, 4], strides = [1, 1]} : vector<8x16xf32> to vector<8x4xf32>
    %65 = arith.truncf %64 : vector<8x4xf32> to vector<8x4xbf16>
    %c0_32 = arith.constant 0 : index
    %c1 = arith.constant 1 : index
    %c0_33 = arith.constant 0 : index
    %c0_34 = arith.constant 0 : index
    %66 = vector.load %arg7[%c0_32, %c1, %c0_33, %c0_34] : memref<1x4x8x8xbf16, #tpu.memory_space<vmem>>, vector<1x1x8x4xbf16>
    %67 = vector.shape_cast %66 : vector<1x1x8x4xbf16> to vector<8x4xbf16>
    %68 = vector.shape_cast %65 : vector<8x4xbf16> to vector<1x1x8x4xbf16>
    tpu.vector_store %arg7[%c0_32, %c1, %c0_33, %c0_34], %68 {strides = array<i32>} : memref<1x4x8x8xbf16, #tpu.memory_space<vmem>>, vector<1x1x8x4xbf16>,
    %69 = vector.extract_strided_slice %32 {offsets = [0, 4], sizes = [8, 4], strides = [1, 1]} : vector<8x16xf32> to vector<8x4xf32>
    %70 = arith.truncf %69 : vector<8x4xf32> to vector<8x4xbf16>
    %c0_35 = arith.constant 0 : index
    %c1_36 = arith.constant 1 : index
    %c0_37 = arith.constant 0 : index
    %c4_38 = arith.constant 4 : index
    %71 = vector.load %arg7[%c0_35, %c1_36, %c0_37, %c4_38] : memref<1x4x8x8xbf16, #tpu.memory_space<vmem>>, vector<1x1x8x4xbf16>
    %72 = vector.shape_cast %71 : vector<1x1x8x4xbf16> to vector<8x4xbf16>
    %73 = vector.shape_cast %70 : vector<8x4xbf16> to vector<1x1x8x4xbf16>
    tpu.vector_store %arg7[%c0_35, %c1_36, %c0_37, %c4_38], %73 {strides = array<i32>} : memref<1x4x8x8xbf16, #tpu.memory_space<vmem>>, vector<1x1x8x4xbf16>,
    %74 = vector.extract_strided_slice %35 {offsets = [0, 4], sizes = [8, 4], strides = [1, 1]} : vector<8x16xf32> to vector<8x4xf32>
    %75 = arith.truncf %74 : vector<8x4xf32> to vector<8x4xbf16>
    %c0_39 = arith.constant 0 : index
    %c1_40 = arith.constant 1 : index
    %c0_41 = arith.constant 0 : index
    %c0_42 = arith.constant 0 : index
    %76 = vector.load %arg8[%c0_39, %c1_40, %c0_41, %c0_42] : memref<1x4x8x8xbf16, #tpu.memory_space<vmem>>, vector<1x1x8x4xbf16>
    %77 = vector.shape_cast %76 : vector<1x1x8x4xbf16> to vector<8x4xbf16>
    %78 = vector.shape_cast %75 : vector<8x4xbf16> to vector<1x1x8x4xbf16>
    tpu.vector_store %arg8[%c0_39, %c1_40, %c0_41, %c0_42], %78 {strides = array<i32>} : memref<1x4x8x8xbf16, #tpu.memory_space<vmem>>, vector<1x1x8x4xbf16>,
    %79 = vector.extract_strided_slice %38 {offsets = [0, 4], sizes = [8, 4], strides = [1, 1]} : vector<8x16xf32> to vector<8x4xf32>
    %80 = arith.truncf %79 : vector<8x4xf32> to vector<8x4xbf16>
    %c0_43 = arith.constant 0 : index
    %c1_44 = arith.constant 1 : index
    %c0_45 = arith.constant 0 : index
    %c4_46 = arith.constant 4 : index
    %81 = vector.load %arg8[%c0_43, %c1_44, %c0_45, %c4_46] : memref<1x4x8x8xbf16, #tpu.memory_space<vmem>>, vector<1x1x8x4xbf16>
    %82 = vector.shape_cast %81 : vector<1x1x8x4xbf16> to vector<8x4xbf16>
    %83 = vector.shape_cast %80 : vector<8x4xbf16> to vector<1x1x8x4xbf16>
    tpu.vector_store %arg8[%c0_43, %c1_44, %c0_45, %c4_46], %83 {strides = array<i32>} : memref<1x4x8x8xbf16, #tpu.memory_space<vmem>>, vector<1x1x8x4xbf16>,
    %84 = vector.extract_strided_slice %20 {offsets = [0, 8], sizes = [8, 8], strides = [1, 1]} : vector<8x32xf32> to vector<8x8xf32>
    %85 = arith.truncf %84 : vector<8x8xf32> to vector<8x8xbf16>
    %c0_47 = arith.constant 0 : index
    %c1_48 = arith.constant 1 : index
    %c0_49 = arith.constant 0 : index
    %c0_50 = arith.constant 0 : index
    %86 = vector.load %arg9[%c0_47, %c1_48, %c0_49, %c0_50] : memref<1x4x8x8xbf16, #tpu.memory_space<vmem>>, vector<1x1x8x8xbf16>
    %87 = vector.shape_cast %86 : vector<1x1x8x8xbf16> to vector<8x8xbf16>
    %88 = vector.shape_cast %85 : vector<8x8xbf16> to vector<1x1x8x8xbf16>
    tpu.vector_store %arg9[%c0_47, %c1_48, %c0_49, %c0_50], %88 {strides = array<i32>} : memref<1x4x8x8xbf16, #tpu.memory_space<vmem>>, vector<1x1x8x8xbf16>,
    %89 = vector.extract_strided_slice %29 {offsets = [0, 8], sizes = [8, 4], strides = [1, 1]} : vector<8x16xf32> to vector<8x4xf32>
    %90 = arith.truncf %89 : vector<8x4xf32> to vector<8x4xbf16>
    %c0_51 = arith.constant 0 : index
    %c2 = arith.constant 2 : index
    %c0_52 = arith.constant 0 : index
    %c0_53 = arith.constant 0 : index
    %91 = vector.load %arg7[%c0_51, %c2, %c0_52, %c0_53] : memref<1x4x8x8xbf16, #tpu.memory_space<vmem>>, vector<1x1x8x4xbf16>
    %92 = vector.shape_cast %91 : vector<1x1x8x4xbf16> to vector<8x4xbf16>
    %93 = vector.shape_cast %90 : vector<8x4xbf16> to vector<1x1x8x4xbf16>
    tpu.vector_store %arg7[%c0_51, %c2, %c0_52, %c0_53], %93 {strides = array<i32>} : memref<1x4x8x8xbf16, #tpu.memory_space<vmem>>, vector<1x1x8x4xbf16>,
    %94 = vector.extract_strided_slice %32 {offsets = [0, 8], sizes = [8, 4], strides = [1, 1]} : vector<8x16xf32> to vector<8x4xf32>
    %95 = arith.truncf %94 : vector<8x4xf32> to vector<8x4xbf16>
    %c0_54 = arith.constant 0 : index
    %c2_55 = arith.constant 2 : index
    %c0_56 = arith.constant 0 : index
    %c4_57 = arith.constant 4 : index
    %96 = vector.load %arg7[%c0_54, %c2_55, %c0_56, %c4_57] : memref<1x4x8x8xbf16, #tpu.memory_space<vmem>>, vector<1x1x8x4xbf16>
    %97 = vector.shape_cast %96 : vector<1x1x8x4xbf16> to vector<8x4xbf16>
    %98 = vector.shape_cast %95 : vector<8x4xbf16> to vector<1x1x8x4xbf16>
    tpu.vector_store %arg7[%c0_54, %c2_55, %c0_56, %c4_57], %98 {strides = array<i32>} : memref<1x4x8x8xbf16, #tpu.memory_space<vmem>>, vector<1x1x8x4xbf16>,
    %99 = vector.extract_strided_slice %35 {offsets = [0, 8], sizes = [8, 4], strides = [1, 1]} : vector<8x16xf32> to vector<8x4xf32>
    %100 = arith.truncf %99 : vector<8x4xf32> to vector<8x4xbf16>
    %c0_58 = arith.constant 0 : index
    %c2_59 = arith.constant 2 : index
    %c0_60 = arith.constant 0 : index
    %c0_61 = arith.constant 0 : index
    %101 = vector.load %arg8[%c0_58, %c2_59, %c0_60, %c0_61] : memref<1x4x8x8xbf16, #tpu.memory_space<vmem>>, vector<1x1x8x4xbf16>
    %102 = vector.shape_cast %101 : vector<1x1x8x4xbf16> to vector<8x4xbf16>
    %103 = vector.shape_cast %100 : vector<8x4xbf16> to vector<1x1x8x4xbf16>
    tpu.vector_store %arg8[%c0_58, %c2_59, %c0_60, %c0_61], %103 {strides = array<i32>} : memref<1x4x8x8xbf16, #tpu.memory_space<vmem>>, vector<1x1x8x4xbf16>,
    %104 = vector.extract_strided_slice %38 {offsets = [0, 8], sizes = [8, 4], strides = [1, 1]} : vector<8x16xf32> to vector<8x4xf32>
    %105 = arith.truncf %104 : vector<8x4xf32> to vector<8x4xbf16>
    %c0_62 = arith.constant 0 : index
    %c2_63 = arith.constant 2 : index
    %c0_64 = arith.constant 0 : index
    %c4_65 = arith.constant 4 : index
    %106 = vector.load %arg8[%c0_62, %c2_63, %c0_64, %c4_65] : memref<1x4x8x8xbf16, #tpu.memory_space<vmem>>, vector<1x1x8x4xbf16>
    %107 = vector.shape_cast %106 : vector<1x1x8x4xbf16> to vector<8x4xbf16>
    %108 = vector.shape_cast %105 : vector<8x4xbf16> to vector<1x1x8x4xbf16>
    tpu.vector_store %arg8[%c0_62, %c2_63, %c0_64, %c4_65], %108 {strides = array<i32>} : memref<1x4x8x8xbf16, #tpu.memory_space<vmem>>, vector<1x1x8x4xbf16>,
    %109 = vector.extract_strided_slice %20 {offsets = [0, 16], sizes = [8, 8], strides = [1, 1]} : vector<8x32xf32> to vector<8x8xf32>
    %110 = arith.truncf %109 : vector<8x8xf32> to vector<8x8xbf16>
    %c0_66 = arith.constant 0 : index
    %c2_67 = arith.constant 2 : index
    %c0_68 = arith.constant 0 : index
    %c0_69 = arith.constant 0 : index
    %111 = vector.load %arg9[%c0_66, %c2_67, %c0_68, %c0_69] : memref<1x4x8x8xbf16, #tpu.memory_space<vmem>>, vector<1x1x8x8xbf16>
    %112 = vector.shape_cast %111 : vector<1x1x8x8xbf16> to vector<8x8xbf16>
    %113 = vector.shape_cast %110 : vector<8x8xbf16> to vector<1x1x8x8xbf16>
    tpu.vector_store %arg9[%c0_66, %c2_67, %c0_68, %c0_69], %113 {strides = array<i32>} : memref<1x4x8x8xbf16, #tpu.memory_space<vmem>>, vector<1x1x8x8xbf16>,
    %114 = vector.extract_strided_slice %29 {offsets = [0, 12], sizes = [8, 4], strides = [1, 1]} : vector<8x16xf32> to vector<8x4xf32>
    %115 = arith.truncf %114 : vector<8x4xf32> to vector<8x4xbf16>
    %c0_70 = arith.constant 0 : index
    %c3 = arith.constant 3 : index
    %c0_71 = arith.constant 0 : index
    %c0_72 = arith.constant 0 : index
    %116 = vector.load %arg7[%c0_70, %c3, %c0_71, %c0_72] : memref<1x4x8x8xbf16, #tpu.memory_space<vmem>>, vector<1x1x8x4xbf16>
    %117 = vector.shape_cast %116 : vector<1x1x8x4xbf16> to vector<8x4xbf16>
    %118 = vector.shape_cast %115 : vector<8x4xbf16> to vector<1x1x8x4xbf16>
    tpu.vector_store %arg7[%c0_70, %c3, %c0_71, %c0_72], %118 {strides = array<i32>} : memref<1x4x8x8xbf16, #tpu.memory_space<vmem>>, vector<1x1x8x4xbf16>,
    %119 = vector.extract_strided_slice %32 {offsets = [0, 12], sizes = [8, 4], strides = [1, 1]} : vector<8x16xf32> to vector<8x4xf32>
    %120 = arith.truncf %119 : vector<8x4xf32> to vector<8x4xbf16>
    %c0_73 = arith.constant 0 : index
    %c3_74 = arith.constant 3 : index
    %c0_75 = arith.constant 0 : index
    %c4_76 = arith.constant 4 : index
    %121 = vector.load %arg7[%c0_73, %c3_74, %c0_75, %c4_76] : memref<1x4x8x8xbf16, #tpu.memory_space<vmem>>, vector<1x1x8x4xbf16>
    %122 = vector.shape_cast %121 : vector<1x1x8x4xbf16> to vector<8x4xbf16>
    %123 = vector.shape_cast %120 : vector<8x4xbf16> to vector<1x1x8x4xbf16>
    tpu.vector_store %arg7[%c0_73, %c3_74, %c0_75, %c4_76], %123 {strides = array<i32>} : memref<1x4x8x8xbf16, #tpu.memory_space<vmem>>, vector<1x1x8x4xbf16>,
    %124 = vector.extract_strided_slice %35 {offsets = [0, 12], sizes = [8, 4], strides = [1, 1]} : vector<8x16xf32> to vector<8x4xf32>
    %125 = arith.truncf %124 : vector<8x4xf32> to vector<8x4xbf16>
    %c0_77 = arith.constant 0 : index
    %c3_78 = arith.constant 3 : index
    %c0_79 = arith.constant 0 : index
    %c0_80 = arith.constant 0 : index
    %126 = vector.load %arg8[%c0_77, %c3_78, %c0_79, %c0_80] : memref<1x4x8x8xbf16, #tpu.memory_space<vmem>>, vector<1x1x8x4xbf16>
    %127 = vector.shape_cast %126 : vector<1x1x8x4xbf16> to vector<8x4xbf16>
    %128 = vector.shape_cast %125 : vector<8x4xbf16> to vector<1x1x8x4xbf16>
    tpu.vector_store %arg8[%c0_77, %c3_78, %c0_79, %c0_80], %128 {strides = array<i32>} : memref<1x4x8x8xbf16, #tpu.memory_space<vmem>>, vector<1x1x8x4xbf16>,
    %129 = vector.extract_strided_slice %38 {offsets = [0, 12], sizes = [8, 4], strides = [1, 1]} : vector<8x16xf32> to vector<8x4xf32>
    %130 = arith.truncf %129 : vector<8x4xf32> to vector<8x4xbf16>
    %c0_81 = arith.constant 0 : index
    %c3_82 = arith.constant 3 : index
    %c0_83 = arith.constant 0 : index
    %c4_84 = arith.constant 4 : index
    %131 = vector.load %arg8[%c0_81, %c3_82, %c0_83, %c4_84] : memref<1x4x8x8xbf16, #tpu.memory_space<vmem>>, vector<1x1x8x4xbf16>
    %132 = vector.shape_cast %131 : vector<1x1x8x4xbf16> to vector<8x4xbf16>
    %133 = vector.shape_cast %130 : vector<8x4xbf16> to vector<1x1x8x4xbf16>
    tpu.vector_store %arg8[%c0_81, %c3_82, %c0_83, %c4_84], %133 {strides = array<i32>} : memref<1x4x8x8xbf16, #tpu.memory_space<vmem>>, vector<1x1x8x4xbf16>,
    %134 = vector.extract_strided_slice %20 {offsets = [0, 24], sizes = [8, 8], strides = [1, 1]} : vector<8x32xf32> to vector<8x8xf32>
    %135 = arith.truncf %134 : vector<8x8xf32> to vector<8x8xbf16>
    %c0_85 = arith.constant 0 : index
    %c3_86 = arith.constant 3 : index
    %c0_87 = arith.constant 0 : index
    %c0_88 = arith.constant 0 : index
    %136 = vector.load %arg9[%c0_85, %c3_86, %c0_87, %c0_88] : memref<1x4x8x8xbf16, #tpu.memory_space<vmem>>, vector<1x1x8x8xbf16>
    %137 = vector.shape_cast %136 : vector<1x1x8x8xbf16> to vector<8x8xbf16>
    %138 = vector.shape_cast %135 : vector<8x8xbf16> to vector<1x1x8x8xbf16>
    tpu.vector_store %arg9[%c0_85, %c3_86, %c0_87, %c0_88], %138 {strides = array<i32>} : memref<1x4x8x8xbf16, #tpu.memory_space<vmem>>, vector<1x1x8x8xbf16>,
    return
  }
  func.func @transform_0(%arg0: i32, %arg1: i32) -> (i32, i32, i32) {
    %c0_i32 = arith.constant 0 : i32
    %c0_i32_0 = arith.constant 0 : i32
    return %arg0, %arg1, %c0_i32 : i32, i32, i32
  }
  func.func @transform_1(%arg0: i32, %arg1: i32) -> (i32, i32) {
    %c0_i32 = arith.constant 0 : i32
    %c0_i32_0 = arith.constant 0 : i32
    %c0_i32_1 = arith.constant 0 : i32
    return %c0_i32, %c0_i32_0 : i32, i32
  }
  func.func @transform_2(%arg0: i32, %arg1: i32) -> (i32, i32) {
    %c0_i32 = arith.constant 0 : i32
    %c0_i32_0 = arith.constant 0 : i32
    %c0_i32_1 = arith.constant 0 : i32
    return %c0_i32, %c0_i32_0 : i32, i32
  }
  func.func @transform_3(%arg0: i32, %arg1: i32) -> (i32, i32) {
    %c0_i32 = arith.constant 0 : i32
    %c0_i32_0 = arith.constant 0 : i32
    return %arg1, %c0_i32 : i32, i32
  }
  func.func @transform_4(%arg0: i32, %arg1: i32) -> (i32, i32) {
    %c0_i32 = arith.constant 0 : i32
    %c0_i32_0 = arith.constant 0 : i32
    return %arg1, %c0_i32 : i32, i32
  }
  func.func @transform_5(%arg0: i32, %arg1: i32) -> (i32, i32, i32, i32) {
    %c0_i32 = arith.constant 0 : i32
    %c0_i32_0 = arith.constant 0 : i32
    %c0_i32_1 = arith.constant 0 : i32
    return %arg0, %c0_i32, %arg1, %c0_i32_0 : i32, i32, i32, i32
  }
  func.func @transform_6(%arg0: i32, %arg1: i32) -> (i32, i32, i32, i32) {
    %c0_i32 = arith.constant 0 : i32
    %c0_i32_0 = arith.constant 0 : i32
    %c0_i32_1 = arith.constant 0 : i32
    return %arg0, %c0_i32, %arg1, %c0_i32_0 : i32, i32, i32, i32
  }
  func.func @transform_7(%arg0: i32, %arg1: i32) -> (i32, i32, i32, i32) {
    %c0_i32 = arith.constant 0 : i32
    %c0_i32_0 = arith.constant 0 : i32
    %c0_i32_1 = arith.constant 0 : i32
    return %arg0, %c0_i32, %arg1, %c0_i32_0 : i32, i32, i32, i32
  }
}

</mosaic_0001>

<bundles_post_ra>
// kernel: tpu_custom_call.1
= control target key start
LH: loop header
LB: loop body
LE: loop exit
PB: predicated region body
PF: predicated region fallthrough
CT: control target
= control target key end

     0   :  { %s1724_s0 = inlined_call_operand.hbm [shape: f32[2,8,32], index: 0, kind: input, shape index: {}]   ;;  %s1725_s1 = inlined_call_operand.hbm [shape: f32[1,32], index: 1, kind: input, shape index: {}]   ;;  %s1726_s2 = inlined_call_operand.hbm [shape: bf16[32,96], index: 2, kind: input, shape index: {}]   ;;  %s1727_s3 = inlined_call_operand.hbm [shape: f32[8,16], index: 3, kind: input, shape index: {}]   ;;  %s1728_s4 = inlined_call_operand.hbm [shape: f32[8,16], index: 4, kind: input, shape index: {}]   ;;  %s1729_s5 = inlined_call_operand.hbm [shape: bf16[2,4,8,8], index: 5, kind: output, shape index: {0}]   ;;  %s1730_s6 = inlined_call_operand.hbm [shape: bf16[2,4,8,8], index: 6, kind: output, shape index: {1}]   ;;  %s1731_s7 = inlined_call_operand.hbm [shape: bf16[2,4,8,8], index: 7, kind: output, shape index: {2}]  }
   0x1   :  { %1737 = sst [smem:[#allocation20_spill]] %s1724_s0 }
   0x2   :  { %1738 = sst [smem:[#allocation21_spill]] %s1725_s1 }
   0x3   :  { %1739 = sst [smem:[#allocation22_spill]] %s1726_s2 }
   0x4   :  { %1740 = sst [smem:[#allocation23_spill]] %s1727_s3 }
   0x5   :  { %1741 = sst [smem:[#allocation24_spill]] %s1728_s4 }
   0x6   :  { %13 = vsyncpa [#allocation3], 0 }
   0x7   :  { %15 = vsyncpa [#allocation3 + $0x1], 0 }
   0x8   :  { %16 = vsyncpa [#allocation6], 0 }
   0x9   :  { %17 = vsyncpa [#allocation9], 0 }
   0xa   :  { %18 = vsyncpa [#allocation4], 0 }
   0xb   :  { %20 = vsyncpa [#allocation4 + $0x1], 0 }
   0xc   :  { %21 = vsyncpa [#allocation13], 0 }
   0xd   :  { %23 = vsyncpa [#allocation13 + $0x1], 0  ;;  %s1437_s24 = smov 0   ;;  %s1439_s25 = smov 0  }
   0xe   :  { %s1441_s26 = smov 0   ;;  %s1443_s27 = smov 0  }
   0xf   :  { %s1445_s28 = smov 0   ;;  %s1447_s29 = smov 0  }
  0x10 LB: > { %s1468_s30 = sadd.s32 4294967295, %s1372_s29   ;;  %p878_p0 = scmp.ge.s32.totalorder %s1372_s29, 1  ;;  %s1372_s29 = sphi %s1447_s29, %s29_s29   ;;  %s1368_s28 = sphi %s1445_s28, %s1759_s28   ;;  %s1364_s27 = sphi %s1443_s27, %s1758_s27   ;;  %s1360_s26 = sphi %s1441_s26, %s1757_s26   ;;  %s1356_s25 = sphi %s1439_s25, %s1756_s25   ;;  %s1352_s24 = sphi %s1437_s24, %s1755_s24  }
  0x11   : > { %p64_p1 = scmp.eq.s32.totalorder %s1468_s30, 0  ;;  %p252_p2 = scmp.lt.s32.totalorder %s1372_s29, 3 }
  0x12   : > { %s1742_s1 = sld [smem:[#allocation21_spill]]  ;;  %p883_p4 = scmp.ge.s32.totalorder %s1372_s29, 2 }
  0x13   : > { %p1476_p3 = pnand %p878_p0, %p252_p2  ;;  %s1374_s12 = smov [#allocation5]  }
  0x14   : > { %s266_s13 = sshll.u32 %s1374_s12, 4  ;;  %s1744_s3 = sld [smem:[#allocation23_spill]]  ;;  %s267_s13 = int_to_ptr.vmem [resolvable:$true] %s266_s13 }
  0x15   : > { %p959_p5 = pneg %p1476_p3  ;;  %s1746_s2 = sld [smem:[#allocation22_spill]] }
  0x16   : > { %s1375_s21 = smov [#allocation8]   ;;  %s1376_s23 = smov [#allocation7]  }
  0x17   : > { %p1488_p6 = pnand %p959_p5, %p64_p1  ;;  %s294_s22 = sshll.u32 %s1375_s21, 4  ;;  %s295_s22 = int_to_ptr.vmem [resolvable:$true] %s294_s22 }
  0x18   : > { %s264_s10 = sshll.u32 %s1742_s1, 4  ;;  %s277_s8 = sshll.u32 %s1376_s23, 4  ;;  %s265_s10 = int_to_ptr.hbm [resolvable:$true] %s264_s10  ;;  %s278_s8 = int_to_ptr.vmem [resolvable:$true] %s277_s8 }
  0x19   : > { %962 = dma.hbm_to_vmem [thread:$0]  (!%p1488_p6), %s265_s10, 16, %s267_s13, [#allocation6]  }
  0x1a   : > { %s292_s16 = sshll.u32 %s1744_s3, 4  ;;  %s1747_s4 = sld [smem:[#allocation24_spill]]  ;;  %s293_s16 = int_to_ptr.hbm [resolvable:$true] %s292_s16 }
  0x1b   : > { %s275_s20 = sshll.u32 %s1746_s2, 4  ;;  %s1377_s10 = smov 64   ;;  %s276_s20 = int_to_ptr.hbm [resolvable:$true] %s275_s20 }
  0x1c   : > { %968 = dma.hbm_to_vmem [thread:$0]  (!%p1488_p6), %s293_s16, 128, %s295_s22, [#allocation9]  }
  0x1d   : > { %s1378_s13 = smov 4   ;;  %s1379_s15 = smov [#allocation10]  }
  0x1e   : > { %965 = dma.hbm_to_vmem [thread:$0]  (!%p1488_p6), %s276_s20, 256, %s278_s8, [#allocation6], %s1377_s10, %s1377_s10, %s1378_s13  }
  0x1f   : > { %s308_s16 = sshll.u32 %s1379_s15, 4  ;;  %s41_s18 = sadd.s32 1, %s1368_s28  ;;  %s309_s16 = int_to_ptr.vmem [resolvable:$true] %s308_s16 }
  0x20   : > { %s306_s14 = sshll.u32 %s1747_s4, 4  ;;  %s1732_s19 = sadd.s32 4294967294, %s1372_s29   ;;  %s307_s14 = int_to_ptr.hbm [resolvable:$true] %s306_s14 }
  0x21   : > { %971 = dma.hbm_to_vmem [thread:$0]  (!%p1488_p6), %s307_s14, 128, %s309_s16, [#allocation9]  }
  0x22   : > { %p43_p7 = scmp.ge.s32.totalorder %s41_s18, 2  ;;  %s50_s21 = sadd.s32 1, %s1360_s26 }
  0x23   : > { %p57_p8 = scmp.ne.s32.totalorder %s1360_s26, %s1356_s25  ;;  %p58_p9 = scmp.eq.s32.totalorder %s1372_s29, 0 }
  0x24   : > { %s1761_s18 = smov (%p43_p7, %s41_s18), 0  ;;  %p63_p10 = scmp.ne.s32.totalorder %s1356_s25, %s1352_s24 }
  0x25   : > { %s45_s20 = ssub.s32 %s1368_s28, %s1761_s18  ;;  %p183_p11 = scmp.eq.s32.totalorder %s1468_s30, 1 }
  0x26   : > { %p48_p12 = scmp.eq.s32.totalorder %s45_s20, 0  ;;  %p1521_p13 = por %p64_p1, %p63_p10 }
  0x27   : > { %p1525_p0 = por %p183_p11, %p57_p8  ;;  %p189_p2 = scmp.eq.s32.totalorder %s1732_s19, 1 }
  0x28   : > { %s1532_s23 = scalar_select %p48_p12, %s1360_s26, %s50_s21  }
  0x29   : > { %p59_p5 = por %p58_p9, %p57_p8  ;;  %p1534_p6 = por %p189_p2, %p63_p10 }
  0x2a   : > { %s319_s9 = sand.u32 1, %s1360_s26   ;;  %s885_s12 = sshll.u32 %s1368_s28, 3 }
  0x2b   : > { %p990_p7 = scmp.lt.s32.totalorder %s1372_s29, 2  ;;  %s884_s14 = sshll.u32 %s319_s9, 3 }
  0x2c   : > { %s1751_s0 = sld [smem:[#allocation20_spill]]  ;;  %s323_s20 = scalar_lea.vmem [#allocation2], %s884_s14 }
  0x2d   : > { %s332_s1 = sshll.u32 %s323_s20, 4  ;;  %p973_p11 = pnand %p990_p7, %p59_p5  ;;  %s333_s1 = int_to_ptr.vmem [resolvable:$true] %s332_s1 }
  0x2e   : > { %s320_s21 = scalar_lea.sflag [#allocation3], %s319_s9  ;;  %s1547_s19 = sand.u32 (!%p1476_p3), 1, %s1356_s25  }
  0x2f   : > { %s887_s2 = sshll.u32 (!%p1476_p3), %s1547_s19, 3  ;;  %s344_s10 = scalar_lea.sflag (!%p1476_p3), [#allocation3], %s1547_s19 }
  0x30   : > { %341 = sbr.rel (%p1476_p3) target bundleno = 616 (0x268), region = 40 }
  0x32   : > { %s328_s15 = scalar_lea.hbm %s1751_s0, %s885_s12  ;;  %s347_s12 = scalar_lea.vmem (!%p1476_p3), [#allocation2], %s887_s2 }
  0x33   : > { %s330_s16 = sshll.u32 %s328_s15, 4  ;;  %s331_s16 = int_to_ptr.hbm [resolvable:$true] %s330_s16 }
  0x34   : > { %975 = dma.hbm_to_vmem [thread:$0]  (!%p973_p11), %s331_s16, 128, %s333_s1, %s320_s21  }
  0x35   : > { %1331 = dma.done.wait (%p1521_p13), %s344_s10, 128  }
  0x36   : > { %1333 = vsyncadd (%p1521_p13), %s344_s10, 4294967168 }
  0x37   : > { %1335 = dma.done.wait (%p64_p1), [#allocation6], 272  }
  0x38   : > { %1337 = vsyncadd (%p64_p1), [#allocation6], 4294967024 }
  0x39   : > { %1339 = dma.done.wait (%p64_p1), [#allocation9], 256  }
  0x3a   : > { %1341 = vsyncadd (%p64_p1), [#allocation9], 4294967040  ;;  %v410_v0 = vld [vmem:[%s347_s12] sm:$0xff]  ;;  %vm413_vm0 = vcmask 261120   ;;  %v1380_v3 = vmov 32.0   ;;  %s1381_s1 = smov 16  }
  0x3b   : > { %v412_v1 = vmul.f32 %v410_v0, %v410_v0  ;;  %1068 = vrcp.f32 %v1380_v3  ;;  %v931_v7 = vld [vmem:[#allocation7 + $0x8] sm:$0xff]  ;;  %v1564_v8 = vld [vmem:[#allocation10] sm:$0xff]  ;;  %s1382_s2 = smov 48   ;;  %v930_v10 = vld [vmem:[#allocation7] sm:$0xff]  ;;  %s1383_s11 = smov 32   ;;  %vm551_vm5 = vcmask 60416  }
  0x3c   : > { %478 = vrot.lane.b32.xlu1 %v1564_v8, %s1381_s1  ;;  %467 = vmatpush.bf16.msra.mxu0 %v931_v7  ;;  %v1569_v12 = vld [vmem:[#allocation8] sm:$0xff]  ;;  %v1067_v23 = vld [vmem:[#allocation5] ss:$0 sm:$0xff]  ;;  %s1384_s17 = smov 112   ;;  %s1733_s9 = smov 64   ;;  %vm525_vm6 = vcmask 27648  }
  0x3d   : > { %v414_v2 = vsel %vm413_vm0, %v412_v1, 0.0  ;;  %489 = vrot.lane.b32.xlu2 %v1569_v12, %s1381_s1  ;;  %s1386_s14 = smov 56   ;;  %s1387_s13 = smov 96   ;;  %vm532_vm7 = vcmask 60448  }
  0x3e   : > { %415 = vadd.xlane.f32.xlu0 %v414_v2  ;;  %s1580_s15 = sshll.u32 %s1547_s19, 4  ;;  %s1388_s16 = smov 92  }
  0x3f   : > { %s1389_s20 = smov 100   ;;  %s1583_s21 = scalar_lea.vmem [#allocation14], %s1580_s15 }
  0x40   : > { %468 = vmatpush.bf16.msra.mxu0 %v930_v10  ;;  %s1390_s10 = smov 88   ;;  %s1590_s12 = scalar_lea.vmem [#allocation11], %s1580_s15 }
  0x41   : > { %v1069_v4 = vpop.eup %1068  ;;  %s1391_s1 = smov 124   ;;  %s1242_s0 = scalar_lea.hbm %s1729_s5, 32 }
  0x42   : > { %v418_v5 = vmul.f32 32.0, %v1069_v4  ;;  %vm422_vm1 = vweird.f32 %v1069_v4 }
  0x44   : > { %v419_v6 = vsub.f32 1.0, %v418_v5  ;;  %515 = vrot.lane.b32.xlu1 %v1569_v12, %s1382_s2 }
  0x45   : > { %498 = vrot.lane.b32.xlu2 %v1569_v12, %s1383_s11 }
  0x46   : > { %v420_v9 = vmul.f32 %v1069_v4, %v419_v6 }
  0x48   : > { %v421_v11 = vadd.f32 %v1069_v4, %v420_v9 }
  0x4a   : > { %v423_v13 = vsel %vm422_vm1, %v1069_v4, %v421_v11 }
  0x4c   : > { %511 = vrot.lane.b32.xlu1 %v1564_v8, %s1383_s11  ;;  %s1735_s11 = smov 4  }
  0x52   : > { %502 = vrot.lane.b32.xlu0 %v1564_v8, %s1382_s2 }
  0x97   : > { %v490_v30 = vpop.permute.xlu2 %489 }
  0x9f   : > { %v499_v39 = vpop.permute.xlu2 %498 }
  0xae   : > { %v479_v29 = vpop.permute.xlu1 %478 }
  0xb1   : > { %v416_v14 = vpop.xlane.xlu0 %415 }
  0xb2   : > { %v424_v15 = vmul.f32 %v423_v13, %v416_v14 }
  0xb4   : > { %v425_v16 = vadd.f32 1e-05, %v424_v15 }
  0xb6   : > { %1070 = vrsqrt.f32 %v425_v16  ;;  %vm432_vm3 = vweird.f32 %v425_v16  ;;  %v516_v36 = vpop.permute.xlu1 %515 }
  0xbc   : > { %v1071_v17 = vpop.eup %1070 }
  0xbd   : > { %v427_v18 = vmul.f32 %v1071_v17, %v425_v16  ;;  %vm433_vm2 = vweird.f32 %v1071_v17 }
  0xbe   : > { %vm434_vm4 = vmor %vm432_vm3, %vm433_vm2  ;;  %v512_v44 = vpop.permute.xlu1 %511 }
  0xbf   : > { %v428_v19 = vmul.f32 %v1071_v17, %v427_v18 }
  0xc1   : > { %v429_v20 = vmul.f32 0.5, %v428_v19 }
  0xc3   : > { %v430_v21 = vsub.f32 1.5, %v429_v20 }
  0xc4   : > { %v503_v28 = vpop.permute.xlu0 %502 }
  0xc5   : > { %v431_v22 = vmul.f32 %v1071_v17, %v430_v21 }
  0xc7   : > { %v435_v24 = vsel %vm434_vm4, %v1071_v17, %v431_v22 }
  0xc8   : > { %v436_v25 = vmul.f32 %v435_v24, %v410_v0 }
  0xca   : > { %v440_v26 = vmul.f32 %v1067_v23, %v436_v25 }
  0xcc   : > { %v441_v27 = vpack.c.bf16 %v440_v26, %v440_v26 }
  0xce   : > { %903 = vmatmul.msk.bf16.vlgmr.msra.gmra.mxu0 %vm413_vm0, %v441_v27 }
 0x14b   : > { %v470_v31 = vpop.f32.mrf.mxu0 }
 0x14c   : > { %v505_v32 = vmul.f32 %v503_v28, %v470_v31  ;;  %v492_v33 = vmul.f32 %v490_v30, %v470_v31  ;;  %v481_v34 = vmul.f32 %v479_v29, %v470_v31  ;;  %v546_v37 = vpack.c.bf16 %v470_v31, %v470_v31 }
 0x14d   : > { %v518_v38 = vmul.f32 %v516_v36, %v470_v31  ;;  %v501_v40 = vmul.f32 %v499_v39, %v470_v31  ;;  %v514_v45 = vmul.f32 %v512_v44, %v470_v31  ;;  %v476_v50 = vmul.f32 %v1569_v12, %v470_v31 }
 0x14e   : > { %494 = vrot.lane.b32.xlu0 %v492_v33, %s1384_s17  ;;  %483 = vrot.lane.b32.xlu1 %v481_v34, %s1384_s17  ;;  %v487_v51 = vmul.f32 %v1564_v8, %v470_v31 }
 0x14f   : > { %507 = vrot.lane.b32.xlu2 %v505_v32, %s1384_s17 }
 0x153   : > { %v472_v35 = vpop.f32.mrf.mxu0 }
 0x156   : > { %548 = vrot.lane.b32.xlu1 %v546_v37, %s1733_s9  ;;  %s1396_s9 = smov 40  }
 0x157   : > { %520 = vrot.lane.b32.xlu2 %v518_v38, %s1384_s17  ;;  %s1393_s17 = smov 84  }
 0x15f   : > { %569 = vrot.lane.b32.xlu2 %v546_v37, %s1386_s14  ;;  %s1394_s14 = smov 116  }
 0x1a9   : > { %v508_v41 = vpop.permute.xlu2 %507 }
 0x1aa   : > { %v510_v42 = vsub.f32 %v501_v40, %v508_v41 }
 0x1ac   : > { %v534_v43 = vpack.c.bf16 %v510_v42, %v510_v42 }
 0x1ae   : > { %536 = vrot.lane.b32.xlu2 %v534_v43, %s1387_s13 }
 0x1b1   : > { %v521_v46 = vpop.permute.xlu2 %520 }
 0x1b2   : > { %v523_v47 = vadd.f32 %v521_v46, %v514_v45 }
 0x1b4   : > { %v540_v48 = vpack.c.bf16 %v523_v47, %v523_v47 }
 0x1b6   : > { %560 = vrot.lane.b32.xlu2 %v534_v43, %s1388_s16  ;;  %542 = vrot.lane.b32.xlu0 %v540_v48, %s1389_s20  ;;  %s1395_s20 = smov 120  }
 0x1b9   : > { %v570_v49 = vpop.permute.xlu2 %569 }
 0x1ba   : > { %908 = vst.msk [vmem:[%s1583_s21 + $0x4] sm:$0xf] %vm551_vm5, %v570_v49 }
 0x1be   : > { %583 = vrot.lane.b32.xlu0 %v534_v43, %s1390_s10 }
 0x1c0   : > { %v484_v52 = vpop.permute.xlu1 %483  ;;  %v495_v53 = vpop.permute.xlu0 %494 }
 0x1c1   : > { %v486_v54 = vsub.f32 %v476_v50, %v484_v52  ;;  %v497_v55 = vadd.f32 %v495_v53, %v487_v51 }
 0x1c3   : > { %v524_v56 = vpack.c.bf16 %v486_v54, %v486_v54  ;;  %v527_v57 = vpack.c.bf16 %v497_v55, %v497_v55 }
 0x1c5   : > { %526 = vst.msk [vmem:[%s1590_s12] sm:$0xf] %vm525_vm6, %v524_v56  ;;  %554 = vrot.lane.b32.xlu2 %v524_v56, %s1391_s1  ;;  %529 = vrot.lane.b32.xlu1 %v527_v57, %s1735_s11 }
 0x1c6   : > { %565 = vrot.lane.b32.xlu0 %v540_v48, %s1387_s13  ;;  %s1600_s13 = scalar_lea.vmem [#allocation12], %s1580_s15 }
 0x1c8   : > { %v549_v58 = vpop.permute.xlu1 %548 }
 0x1c9   : > { %552 = vst.msk [vmem:[%s1583_s21] sm:$0xf] %vm551_vm5, %v549_v58 }
 0x1cd   : > { %588 = vrot.lane.b32.xlu2 %v540_v48, %s1388_s16  ;;  %606 = vrot.lane.b32.xlu1 %v534_v43, %s1393_s17 }
 0x1ce   : > { %597 = vrot.lane.b32.xlu0 %v524_v56, %s1394_s14 }
 0x1d5   : > { %602 = vrot.lane.b32.xlu2 %v527_v57, %s1395_s20  ;;  %574 = vrot.lane.b32.xlu1 %v524_v56, %s1395_s20  ;;  %s621_s20 = scalar_lea.sflag [#allocation4], %s1547_s19 }
 0x1d6   : > { %579 = vrot.lane.b32.xlu0 %v527_v57, %s1391_s1 }
 0x1dd   : > { %611 = vrot.lane.b32.xlu1 %v540_v48, %s1390_s10  ;;  %s644_s10 = sshll.u32 %s1590_s12, 4  ;;  %s645_s10 = int_to_ptr.vmem [resolvable:$true] %s644_s10 }
 0x1de   : > { %615 = vrot.lane.b32.xlu0 %v546_v37, %s1396_s9 }
 0x1e5   : > { %592 = vrot.lane.b32.xlu1 %v546_v37, %s1382_s2  ;;  %s1621_s2 = sshll.u32 %s1364_s27, 4 }
 0x1e6   : > { %s643_s16 = scalar_lea.hbm %s1729_s5, %s1621_s2  ;;  %s661_s14 = scalar_lea.hbm %s1730_s6, %s1621_s2 }
 0x1e7   : > { %s646_s27 = sshll.u32 %s643_s16, 4  ;;  %s647_s27 = int_to_ptr.hbm [resolvable:$true] %s646_s27 }
 0x1e8   : > { %s1236_s9 = sshra.s32 %s647_s27, 4  ;;  %s1237_s9 = int_to_ptr.hbm [resolvable:$true] %s1236_s9 }
 0x1e9   : > { %s1238_s15 = scalar_lea.hbm %s1237_s9, 16  ;;  %p1243_p9 = scmp.lt.s32.totalorder %s1237_s9, %s1729_s5 }
 0x1ea   : > { %p1239_p1 = scmp.ne.s32.totalorder %s1237_s9, %s1238_s15  ;;  %p1244_p10 = scmp.lt.s32.totalorder %s1242_s0, %s1238_s15 }
 0x1ec   : > { %p1240_p3 = pnand %p1239_p1, %p1525_p0  ;;  %p1245_p12 = por %p1244_p10, %p1243_p9 }
 0x1ee   : > { %p1241_p8 = pneg %p1240_p3 }
 0x1f0   : > { %p1246_p13 = pnand %p1245_p12, %p1241_p8 }
 0x208   : > { %v537_v59 = vpop.permute.xlu2 %536 }
 0x209   : > { %539 = vst.msk [vmem:[%s1600_s13] sm:$0xf] %vm525_vm6, %v537_v59 }
 0x210   : > { %v561_v60 = vpop.permute.xlu2 %560 }
 0x211   : > { %906 = vst.msk [vmem:[%s1600_s13 + $0x4] sm:$0xf] %vm525_vm6, %v561_v60 }
 0x21f   : > { %v555_v61 = vpop.permute.xlu2 %554 }
 0x220   : > { %904 = vst.msk [vmem:[%s1590_s12 + $0x4] sm:$0xf] %vm525_vm6, %v555_v61 }
 0x221   : > { %905 = vst.msk [vmem:[%s1590_s12 + $0x4] sm:$0xf] %vm532_vm7, %v527_v57 }
 0x227   : > { %v589_v0 = vpop.permute.xlu2 %588 }
 0x228   : > { %v543_v62 = vpop.permute.xlu0 %542 }
 0x229   : > { %545 = vst.msk [vmem:[%s1600_s13] sm:$0xf] %vm532_vm7, %v543_v62 }
 0x22f   : > { %v603_v5 = vpop.permute.xlu2 %602 }
 0x230   : > { %v584_v63 = vpop.permute.xlu0 %583 }
 0x231   : > { %911 = vst.msk [vmem:[%s1600_s13 + $0x8] sm:$0xf] %vm525_vm6, %v584_v63 }
 0x232   : > { %912 = vst.msk [vmem:[%s1600_s13 + $0x8] sm:$0xf] %vm532_vm7, %v589_v0 }
 0x237   : > { %v530_v1 = vpop.permute.xlu1 %529 }
 0x238   : > { %533 = vst.msk [vmem:[%s1590_s12] sm:$0xf] %vm532_vm7, %v530_v1  ;;  %v566_v2 = vpop.permute.xlu0 %565 }
 0x239   : > { %907 = vst.msk [vmem:[%s1600_s13 + $0x4] sm:$0xf] %vm532_vm7, %v566_v2 }
 0x23f   : > { %v607_v3 = vpop.permute.xlu1 %606 }
 0x240   : > { %916 = vst.msk [vmem:[%s1600_s13 + $0xc] sm:$0xf] %vm525_vm6, %v607_v3  ;;  %v598_v4 = vpop.permute.xlu0 %597 }
 0x241   : > { %914 = vst.msk [vmem:[%s1590_s12 + $0xc] sm:$0xf] %vm525_vm6, %v598_v4 }
 0x242   : > { %915 = vst.msk [vmem:[%s1590_s12 + $0xc] sm:$0xf] %vm532_vm7, %v603_v5 }
 0x247   : > { %v575_v6 = vpop.permute.xlu1 %574 }
 0x248   : > { %909 = vst.msk [vmem:[%s1590_s12 + $0x8] sm:$0xf] %vm525_vm6, %v575_v6  ;;  %v580_v7 = vpop.permute.xlu0 %579 }
 0x249   : > { %910 = vst.msk [vmem:[%s1590_s12 + $0x8] sm:$0xf] %vm532_vm7, %v580_v7 }
 0x24a   : > { %1249 = shalt.err (!%p1246_p13)
}
 0x24b   : > { %s1752_s19 = smov 4   ;;  %s1753_s12 = smov 64  }
 0x24c   : > { %953 = dma.vmem_to_hbm [thread:$0]  (%p1525_p0), %s645_s10, 256, %s647_s27, %s621_s20, %s1753_s12, %s1753_s12, %s1752_s19  }
 0x24d   : > { %s625_s11 = sand.u32 1, %s1468_s30   ;;  %s662_s1 = sshll.u32 %s1600_s13, 4  ;;  %s663_s1 = int_to_ptr.vmem [resolvable:$true] %s662_s1 }
 0x24e   : > { %s664_s3 = sshll.u32 %s661_s14, 4  ;;  %s679_s17 = scalar_lea.hbm %s1731_s7, %s1621_s2  ;;  %s665_s3 = int_to_ptr.hbm [resolvable:$true] %s664_s3 }
 0x24f   : > { %v612_v8 = vpop.permute.xlu1 %611  ;;  %s1666_s9 = scalar_lea.sflag [#allocation13], %s625_s11  ;;  %s1264_s15 = sshra.s32 %s665_s3, 4  ;;  %s1265_s15 = int_to_ptr.hbm [resolvable:$true] %s1264_s15 }
 0x250   : > { %917 = vst.msk [vmem:[%s1600_s13 + $0xc] sm:$0xf] %vm532_vm7, %v612_v8  ;;  %v616_v9 = vpop.permute.xlu0 %615  ;;  %s1266_s10 = scalar_lea.hbm %s1265_s15, 16  ;;  %s1270_s13 = scalar_lea.hbm %s1730_s6, 32 }
 0x251   : > { %918 = vst.msk [vmem:[%s1583_s21 + $0xc] sm:$0xf] %vm551_vm5, %v616_v9  ;;  %p1267_p2 = scmp.ne.s32.totalorder %s1265_s15, %s1266_s10  ;;  %p1271_p11 = scmp.lt.s32.totalorder %s1265_s15, %s1730_s6 }
 0x252   : > { %p1272_p1 = scmp.lt.s32.totalorder %s1270_s13, %s1266_s10 }
 0x253   : > { %p1268_p5 = pnand %p1267_p2, %p1525_p0 }
 0x254   : > { %p1273_p3 = por %p1272_p1, %p1271_p11 }
 0x255   : > { %p1269_p7 = pneg %p1268_p5 }
 0x257   : > { %p1274_p8 = pnand %p1273_p3, %p1269_p7 }
 0x259   : > { %1277 = shalt.err (!%p1274_p8)
}
 0x25a   : > { %954 = dma.vmem_to_hbm [thread:$0]  (%p1525_p0), %s663_s1, 256, %s665_s3, %s1666_s9, %s1753_s12, %s1753_s12, %s1752_s19   ;;  %v593_v10 = vpop.permute.xlu1 %592 }
 0x25b   : > { %s680_s2 = sshll.u32 %s1583_s21, 4  ;;  %s682_s16 = sshll.u32 %s679_s17, 4  ;;  %913 = vst.msk [vmem:[%s1583_s21 + $0x8] sm:$0xf] %vm551_vm5, %v593_v10  ;;  %s681_s2 = int_to_ptr.vmem [resolvable:$true] %s680_s2  ;;  %s683_s16 = int_to_ptr.hbm [resolvable:$true] %s682_s16 }
 0x25c   : > { %s1292_s11 = sshra.s32 %s683_s16, 4  ;;  %s1298_s10 = scalar_lea.hbm %s1731_s7, 32  ;;  %s1293_s11 = int_to_ptr.hbm [resolvable:$true] %s1292_s11 }
 0x25d   : > { %s1294_s0 = scalar_lea.hbm %s1293_s11, 16  ;;  %p1299_p13 = scmp.lt.s32.totalorder %s1293_s11, %s1731_s7 }
 0x25e   : > { %p1295_p9 = scmp.ne.s32.totalorder %s1293_s11, %s1294_s0  ;;  %p1300_p2 = scmp.lt.s32.totalorder %s1298_s10, %s1294_s0 }
 0x260   : > { %p1296_p10 = pnand %p1295_p9, %p1525_p0  ;;  %p1301_p5 = por %p1300_p2, %p1299_p13 }
 0x262   : > { %p1297_p12 = pneg %p1296_p10 }
 0x264   : > { %p1302_p7 = pnand %p1301_p5, %p1297_p12 }
 0x266   : > { %1305 = shalt.err (!%p1302_p7)
}
 0x267   : > { %955 = dma.vmem_to_hbm [thread:$0]  (%p1525_p0), %s681_s2, 256, %s683_s16, %s1666_s9, %s1753_s12, %s1753_s12, %s1752_s19  }
 0x268 PF: > { %s697_s21 = sand.u32 1, %s1352_s24   ;;  %p977_p11 = pnand %p883_p4, %p1534_p6 }
 0x269   : > { %s698_s3 = scalar_lea.sflag [#allocation4], %s697_s21 }
 0x26a   : > { %p978_p1 = pneg %p977_p11 }
 0x26c   : > { %1343 = dma.done.wait (%p978_p1), %s698_s3, 256  }
 0x26d   : > { %1345 = vsyncadd (%p978_p1), %s698_s3, 4294967040  ;;  %s1754_s17 = sadd.s32 4294967294, %s1372_s29  }
 0x26e   : > { %s707_s22 = sand.u32 1, %s1754_s17  }
 0x26f   : > { %s708_s27 = scalar_lea.sflag [#allocation13], %s707_s22 }
 0x270   : > { %1347 = dma.done.wait (%p978_p1), %s708_s27, 512  }
 0x271   : > { %1349 = vsyncadd (%p978_p1), %s708_s27, 4294966784  ;;  %s29_s29 = sadd.s32 1, %s1372_s29   ;;  %s1755_s24 = smov %s1356_s25 }
 0x272   : > { %p26_p0 = scmp.ge.s32.totalorder %s29_s29, 4   ;;  %s1756_s25 = smov %s1360_s26 }
 0x273   : > { %s1757_s26 = smov %s1532_s23  ;;  %s1758_s27 = smov %s1368_s28 }
 0x274   : > { %s1759_s28 = smov %s1761_s18  ;;  %28 = sbr.rel (!%p26_p0) target bundleno = 16 (0x10), region = 144 }
 0x279   :  { %724 = vsyncpa [#allocation3], 1 }
 0x27a   :  { %726 = vsyncpa [#allocation3 + $0x1], 1 }
 0x27b   :  { %727 = vsyncpa [#allocation6], 1 }
 0x27c   :  { %728 = vsyncpa [#allocation9], 1 }
 0x27d   :  { %729 = vsyncpa [#allocation4], 1 }
 0x27e   :  { %731 = vsyncpa [#allocation4 + $0x1], 1 }
 0x27f   :  { %732 = vsyncpa [#allocation13], 1 }
 0x280   :  { %734 = vsyncpa [#allocation13 + $0x1], 1 }

</bundles_post_ra>
